<compile_context>
chip_gen: v7x
topology: tpu7x:2x2x1
jax: 0.10.0
libtpu: 0.0.40
codegen_flags: <defaults>
</compile_context>

<pallas_src>
import jax
import jax.numpy as jnp
from jax.experimental import pallas as pl
from jax.experimental.pallas import tpu as pltpu

_LANES = 128  # vreg lane width (fast axis)


def _sublane_align(dtype) -> int:
    """Native packed sublane tile: 8 for 32-bit, 16 for 16-bit, 32 for 8-bit."""
    itemsize = jnp.dtype(dtype).itemsize
    return max(8, 8 * (4 // itemsize))


def _sine_kernel(w0_ref, x_ref, o_ref):
    """Elementwise sin(w0 * x) on one (tile_rows, 128) lane-dense tile."""
    w0 = w0_ref[0]                          # SMEM scalar (may be traced)
    x = x_ref[...].astype(jnp.float32)      # f32 VPU/EUP path on all generations
    o_ref[...] = jnp.sin(w0 * x).astype(o_ref.dtype)


def sine_pallas(x, w0=1.0, *, target_tile_bytes=2 * 1024 * 1024):
    """Forward of Sine: sin(w0 * x). Any shape/dtype; PyTorch semantics preserved."""
    orig_shape = x.shape
    n = x.size
    if n == 0:
        return x
    itemsize = jnp.dtype(x.dtype).itemsize
    sub = _sublane_align(x.dtype)

    # ---- lane-dense (rows, 128) view --------------------------------------
    rows = pl.cdiv(n, _LANES)
    ragged = (n % _LANES) != 0
    if not ragged:
        x2d = x.reshape(rows, _LANES)       # free: no extra HBM pass
    else:
        # Ragged tail: minimal pad (< 128 elems) to complete the last lane row.
        # TODO(synk): an in-kernel tail mask would avoid the pad/slice passes;
        # ragged element counts are rare for activation maps.
        x2d = jnp.pad(x.reshape(-1), (0, rows * _LANES - n)).reshape(rows, _LANES)

    # ---- tiling ------------------------------------------------------------
    # ~2 MiB per tile; 4 x tile of VMEM with default double-buffering.
    max_tile_rows = max(sub, (target_tile_bytes // (_LANES * itemsize)) // sub * sub)
    num_tiles = pl.cdiv(rows, max_tile_rows)
    if num_tiles < 2 and rows > sub:
        # Keep >= 2 grid steps so the "parallel" axis can shard across
        # v7x's two TensorCores instead of idling one.
        num_tiles = 2
    tile_rows = max(sub, pl.cdiv(pl.cdiv(rows, num_tiles), sub) * sub)
    num_tiles = pl.cdiv(rows, tile_rows)    # ragged last block handled by Pallas

    w0_arr = jnp.asarray(w0, dtype=jnp.float32).reshape(1)

    out2d = pl.pallas_call(
        _sine_kernel,
        out_shape=jax.ShapeDtypeStruct((rows, _LANES), x.dtype),
        grid=(num_tiles,),
        in_specs=[
            pl.BlockSpec(memory_space=pltpu.MemorySpace.SMEM),    # w0 scalar
            pl.BlockSpec((tile_rows, _LANES), lambda i: (i, 0)),  # x tile
        ],
        out_specs=pl.BlockSpec((tile_rows, _LANES), lambda i: (i, 0)),
        compiler_params=pltpu.CompilerParams(
            dimension_semantics=("parallel",)),
    )(w0_arr, x2d)

    if not ragged:
        return out2d.reshape(orig_shape)
    return out2d.reshape(-1)[:n].reshape(orig_shape)


if __name__ == "__main__":
    # Small shapes consistent with an activation module applied to a feature map.
    B, C, H, W = 2, 4, 16, 16
    w0 = 2.5  # non-default to exercise the scale

    key = jax.random.PRNGKey(0)
    x = jax.random.normal(key, (B, C, H, W), jnp.float32)

    y = sine_pallas(x, w0)
    jax.block_until_ready(y)

    ref = jnp.sin(w0 * x)
    assert y.shape == x.shape and y.dtype == x.dtype
    assert jnp.allclose(y, ref, atol=1e-4, rtol=1e-4)

    print("KERNEL_OK")
</pallas_src>

<mosaic_0001>
module attributes {stable_mosaic.version = 11 : i64} {
  func.func @_sine_kernel(%arg0: i32, %arg1: memref<1xf32, #tpu.memory_space<smem>>, %arg2: memref<8x128xf32, #tpu.memory_space<vmem>>, %arg3: memref<8x128xf32, #tpu.memory_space<vmem>>) attributes {dimension_semantics = [#tpu.dimension_semantics<parallel>], iteration_bounds = array<i64: 2>, scalar_prefetch = 0 : i64, scratch_operands = 0 : i64, tpu.core_type = #tpu.core_type<tc>, window_params = [{transform_indices = @transform_0, window_bounds = array<i64: 1>}, {transform_indices = @transform_1, window_bounds = array<i64: 8, 128>}, {transform_indices = @transform_2, window_bounds = array<i64: 8, 128>}]} {
    %c0 = arith.constant 0 : index
    %0 = memref.load %arg1[%c0] : memref<1xf32, #tpu.memory_space<smem>>
    %c0_0 = arith.constant 0 : index
    %c0_1 = arith.constant 0 : index
    %1 = vector.load %arg2[%c0_0, %c0_1] : memref<8x128xf32, #tpu.memory_space<vmem>>, vector<8x128xf32>
    %2 = vector.broadcast %0 : f32 to vector<8x128xf32>
    %3 = arith.mulf %2, %1 : vector<8x128xf32>
    %4 = math.sin %3 : vector<8x128xf32>
    %c0_2 = arith.constant 0 : index
    %c0_3 = arith.constant 0 : index
    %5 = vector.load %arg3[%c0_2, %c0_3] : memref<8x128xf32, #tpu.memory_space<vmem>>, vector<8x128xf32>
    tpu.vector_store %arg3[%c0_2, %c0_3], %4 {strides = array<i32>} : memref<8x128xf32, #tpu.memory_space<vmem>>, vector<8x128xf32>,
    return
  }
  func.func @transform_0(%arg0: i32) -> i32 {
    %c0_i32 = arith.constant 0 : i32
    %c0_i32_0 = arith.constant 0 : i32
    return %c0_i32 : i32
  }
  func.func @transform_1(%arg0: i32) -> (i32, i32) {
    %c0_i32 = arith.constant 0 : i32
    %c0_i32_0 = arith.constant 0 : i32
    return %arg0, %c0_i32 : i32, i32
  }
  func.func @transform_2(%arg0: i32) -> (i32, i32) {
    %c0_i32 = arith.constant 0 : i32
    %c0_i32_0 = arith.constant 0 : i32
    return %arg0, %c0_i32 : i32, i32
  }
}

</mosaic_0001>

<bundles_post_ra>
// kernel: tpu_custom_call.1
= control target key start
LH: loop header
LB: loop body
LE: loop exit
PB: predicated region body
PF: predicated region fallthrough
CT: control target
= control target key end

     0   :  { %s739_s0 = inlined_call_operand.<no memory space> [shape: f32[1], index: 0, kind: input, shape index: {}]   ;;  %s740_s1 = inlined_call_operand.hbm [shape: f32[16,128], index: 1, kind: input, shape index: {}]   ;;  %s741_s2 = inlined_call_operand.hbm [shape: f32[16,128], index: 2, kind: output, shape index: {}]  }
   0x1   :  { %7 = sst [smem:[#allocation2]] %s739_s0 }
   0x2   :  { %8 = vsyncpa [#allocation4], 0 }
   0x3   :  { %10 = vsyncpa [#allocation4 + $0x1], 0 }
   0x4   :  { %11 = vsyncpa [#allocation5], 0 }
   0x5   :  { %13 = vsyncpa [#allocation5 + $0x1], 0  ;;  %s553_s11 = smov 0   ;;  %s555_s12 = smov 0  }
   0x6   :  { %s557_s13 = smov 0   ;;  %s559_s14 = smov 0  }
   0x7 LB: > { %s574_s0 = sadd.s32 4294967295, %s525_s14   ;;  %s353_s15 = sadd.s32 4294967294, %s525_s14   ;;  %s525_s14 = sphi %s559_s14, %s756_s14   ;;  %s521_s13 = sphi %s557_s13, %s755_s13   ;;  %s517_s12 = sphi %s555_s12, %s754_s12   ;;  %s513_s11 = sphi %s553_s11, %s753_s11  }
   0x8   : > { %s578_s16 = sadd.s32 1, %s525_s14   ;;  %s47_s17 = sadd.s32 1, %s521_s13 }
   0x9   : > { %s44_s18 = ssub.s32 %s525_s14, %s578_s16  ;;  %p54_p0 = scmp.ne.s32.totalorder %s521_s13, %s517_s12 }
   0xa   : > { %p45_p1 = scmp.eq.s32.totalorder %s44_s18, 0  ;;  %p55_p2 = scmp.eq.s32.totalorder %s525_s14, 0 }
   0xb   : > { %p60_p3 = scmp.ne.s32.totalorder %s517_s12, %s513_s11  ;;  %p61_p4 = scmp.eq.s32.totalorder %s574_s0, 0 }
   0xc   : > { %s590_s19 = scalar_select %p45_p1, %s521_s13, %s47_s17  }
   0xd   : > { %p592_p5 = por %p55_p2, %p54_p0  ;;  %p596_p6 = por %p61_p4, %p60_p3 }
   0xe   : > { %p84_p7 = scmp.eq.s32.totalorder %s574_s0, 1  ;;  %p90_p8 = scmp.eq.s32.totalorder %s353_s15, 1 }
   0xf   : > { %p385_p10 = scmp.lt.s32.totalorder %s525_s14, 2  ;;  %s113_s24 = sand.u32 1, %s521_s13  }
  0x10   : > { %p603_p11 = por %p84_p7, %p54_p0  ;;  %p607_p12 = por %p90_p8, %p60_p3 }
  0x11   : > { %s357_s25 = sshll.u32 %s525_s14, 7  ;;  %s356_s26 = sshll.u32 %s113_s24, 3 }
  0x12   : > { %s745_s22 = scalar_select %p603_p11, 1, 0 }
  0x13   : > { %s746_s23 = scalar_select %p607_p12, 1, 0 }
  0x14   : > { %s616_s29 = scalar_lea.hbm %s740_s1, %s357_s25  ;;  %s117_s30 = scalar_lea.vmem [#allocation3], %s356_s26 }
  0x15   : > { %s124_s3 = sshll.u32 %s117_s30, 4  ;;  %p620_p13 = pnand %p385_p10, %p592_p5  ;;  %s624_s3 = int_to_ptr.vmem [resolvable:$true] %s124_s3 }
  0x16   : > { %s114_s5 = scalar_lea.sflag [#allocation4], %s113_s24  ;;  %s429_s6 = scalar_lea.hbm %s616_s29, 128 }
  0x17   : > { %p430_p2 = scmp.ne.s32.totalorder %s616_s29, %s429_s6  ;;  %p431_p3 = pneg %p620_p13 }
  0x18   : > { %s434_s9 = scalar_lea.hbm %s740_s1, 256  ;;  %p435_p5 = scmp.lt.u32.totalorder %s616_s29, %s740_s1 }
  0x19   : > { %p432_p4 = pnand %p431_p3, %p430_p2  ;;  %p436_p8 = scmp.lt.u32.totalorder %s434_s9, %s429_s6 }
  0x1a   : > { %p438_p9 = scmp.lt.u32.totalorder %s429_s6, %s616_s29 }
  0x1b   : > { %p433_p7 = pneg %p432_p4  ;;  %p437_p10 = por %p436_p8, %p435_p5 }
  0x1d   : > { %p439_p0 = por %p438_p9, %p437_p10 }
  0x1f   : > { %p440_p1 = pnand %p439_p0, %p433_p7 }
  0x21   : > { %443 = shalt.err (!%p440_p1)
}
  0x22   : > { %s444_s17 = scalar_lea.vmem %s624_s3, 128  ;;  %s527_s18 = smov [#allocation3]  }
  0x23   : > { %p445_p2 = scmp.ne.s32.totalorder %s624_s3, %s444_s17  ;;  %s449_s20 = sshll.u32 %s527_s18, 4  ;;  %s450_s20 = int_to_ptr.vmem [resolvable:$false] %s449_s20 }
  0x24   : > { %s451_s24 = scalar_lea.vmem %s450_s20, 256  ;;  %p452_p11 = scmp.lt.s32.totalorder %s624_s3, %s450_s20 }
  0x25   : > { %p447_p4 = pnand %p445_p2, %p431_p3  ;;  %p453_p5 = scmp.lt.s32.totalorder %s451_s24, %s444_s17 }
  0x27   : > { %p448_p12 = pneg %p447_p4  ;;  %p454_p8 = por %p453_p5, %p452_p11 }
  0x29   : > { %p455_p9 = pnand %p454_p8, %p448_p12 }
  0x2b   : > { %458 = shalt.err (!%p455_p9)
}
  0x2c   : > { %380 = dma.hbm_to_vmem [thread:$0]  (!%p620_p13), %s616_s29, 128, %s624_s3, %s114_s5  }
  0x2d   : > { %p748_p0 = scmp.lt.s32.totalorder %s525_s14, 3  ;;  %p749_p1 = scmp.ge.s32.totalorder %s525_s14, 1 }
  0x2f   : > { %p130_p3 = pnand %p749_p1, %p748_p0 }
  0x30   : > { %s658_s25 = sand.u32 (!%p130_p3), 1, %s517_s12  }
  0x31   : > { %133 = sbr.rel (%p130_p3) target bundleno = 160 (0xa0), region = 28  ;;  %s359_s26 = sshll.u32 (!%p130_p3), %s658_s25, 3 }
  0x32   : > { %s136_s27 = scalar_lea.sflag (!%p130_p3), [#allocation4], %s658_s25  ;;  %s139_s28 = scalar_lea.vmem (!%p130_p3), [#allocation3], %s359_s26 }
  0x38   : > { %504 = dma.done.wait (%p596_p6), %s136_s27, 128  }
  0x39   : > { %506 = vsyncadd (%p596_p6), %s136_s27, 4294967168  ;;  %s160_s29 = sld [smem:[#allocation2]]  ;;  %v161_v0 = vld [vmem:[%s139_s28] sm:$0xff]  ;;  %v528_v14 = vmov 683565275   ;;  %s159_s21 = scalar_lea.vmem [#allocation6], %s359_s26 }
  0x3a   : > { %v529_v16 = vmov 2475754826   ;;  %v530_v18 = vmov 2131351028   ;;  %v531_v20 = vmov 2102212464  }
  0x3b   : > { %v532_v22 = vmov 920167782   ;;  %v533_v29 = vmov 1326507024   ;;  %s283_s30 = sshll.u32 %s159_s21, 4  ;;  %s366_s3 = sshll.u32 %s574_s0, 7  ;;  %s692_s30 = int_to_ptr.vmem [resolvable:$true] %s283_s30 }
  0x3c   : > { %s697_s6 = scalar_lea.hbm %s741_s2, %s366_s3  ;;  %s270_s7 = scalar_lea.sflag [#allocation5], %s658_s25 }
  0x3d   : > { %s459_s8 = scalar_lea.vmem %s692_s30, 128  ;;  %p750_p11 = scmp.ne.s32.totalorder %s745_s22, 0 }
  0x3e   : > { %p460_p6 = scmp.ne.s32.totalorder %s692_s30, %s459_s8  ;;  %s534_s0 = smov [#allocation6]  }
  0x3f   : > { %v162_v1 = vstv %s160_s29  ;;  %s463_s9 = sshll.u32 %s534_s0, 4  ;;  %s464_s9 = int_to_ptr.vmem [resolvable:$false] %s463_s9 }
  0x40   : > { %v668_v2 = vmul.f32 %v162_v1, %v161_v0  ;;  %p461_p12 = pnand %p460_p6, %p750_p11  ;;  %s465_s10 = scalar_lea.vmem %s464_s9, 256 }
  0x41   : > { %p466_p7 = scmp.lt.s32.totalorder %s692_s30, %s464_s9  ;;  %p467_p10 = scmp.lt.s32.totalorder %s465_s10, %s459_s8 }
  0x42   : > { %v167_v3 = vand.u32 2139095040, %v668_v2  ;;  %v164_v5 = vand.u32 2147483647, %v668_v2  ;;  %vm166_vm7 = vcmp.lt.s32.totalorder %v668_v2, 0  ;;  %vm256_vm12 = vweird.f32 %v668_v2  ;;  %p462_p13 = pneg %p461_p12 }
  0x43   : > { %p468_p2 = por %p467_p10, %p466_p7 }
  0x44   : > { %v168_v4 = vshrl.u32 %v167_v3, 23  ;;  %v171_v8 = vand.u32 8388607, %v164_v5  ;;  %vm165_vm8 = vcmp.le.f32.partialorder %v164_v5, 0.7853982 }
  0x45   : > { %p469_p4 = pnand %p468_p2, %p462_p13 }
  0x46   : > { %v361_v6 = vadd.s32 4294967169, %v168_v4  ;;  %v172_v12 = vor.u32 8388608, %v171_v8 }
  0x48   : > { %v174_v7 = vadd.s32 1, %v361_v6  ;;  %v212_v31 = vshll.u32 %v172_v12, 8 }
  0x4a   : > { %vm175_vm0 = vcmp.gt.s32.totalorder %v174_v7, 0 }
  0x4b   : > { %v176_v9 = vsel %vm175_vm0, %v174_v7, 0 }
  0x4c   : > { %v178_v10 = vand.u32 31, %v176_v9  ;;  %v177_v11 = vshrl.u32 %v176_v9, 5 }
  0x4e   : > { %v179_v13 = vsub.s32 32, %v178_v10  ;;  %v181_v15 = vshll.u32 %v528_v14, %v178_v10  ;;  %v184_v17 = vshll.u32 %v529_v16, %v178_v10  ;;  %v187_v19 = vshll.u32 %v530_v18, %v178_v10 }
  0x4f   : > { %v190_v21 = vshll.u32 %v531_v20, %v178_v10  ;;  %v193_v23 = vshll.u32 %v532_v22, %v178_v10  ;;  %vm196_vm1 = vcmp.lt.s32.totalorder %v177_v11, 1  ;;  %vm199_vm2 = vcmp.lt.s32.totalorder %v177_v11, 4 }
  0x50   : > { %v180_v24 = vshrl.u32 %v528_v14, %v179_v13  ;;  %v182_v25 = vshrl.u32 %v529_v16, %v179_v13  ;;  %v185_v26 = vshrl.u32 %v530_v18, %v179_v13  ;;  %v188_v27 = vshrl.u32 %v531_v20, %v179_v13 }
  0x51   : > { %v191_v28 = vshrl.u32 %v532_v22, %v179_v13  ;;  %v194_v30 = vshrl.u32 %v533_v29, %v179_v13  ;;  %vm197_vm3 = vcmp.lt.s32.totalorder %v177_v11, 2  ;;  %vm198_vm4 = vcmp.lt.s32.totalorder %v177_v11, 3 }
  0x52   : > { %v183_v32 = vor.u32 %v182_v25, %v181_v15  ;;  %v186_v33 = vor.u32 %v185_v26, %v184_v17  ;;  %v189_v34 = vor.u32 %v188_v27, %v187_v19 }
  0x53   : > { %v192_v35 = vor.u32 %v191_v28, %v190_v21  ;;  %v195_v36 = vor.u32 %v194_v30, %v193_v23 }
  0x54   : > { %v200_v37 = vsel %vm196_vm1, %v180_v24, %v183_v32  ;;  %v201_v38 = vsel %vm199_vm2, %v189_v34, 2102212464  ;;  %v204_v39 = vsel %vm196_vm1, %v183_v32, %v186_v33  ;;  %v208_v40 = vsel %vm196_vm1, %v186_v33, %v189_v34 }
  0x55   : > { %v202_v41 = vsel %vm198_vm4, %v186_v33, %v201_v38  ;;  %v205_v42 = vsel %vm199_vm2, %v192_v35, 920167782  ;;  %v209_v43 = vsel %vm199_vm2, %v195_v36, 1326507024 }
  0x56   : > { %v206_v44 = vsel %vm198_vm4, %v189_v34, %v205_v42  ;;  %v210_v45 = vsel %vm198_vm4, %v192_v35, %v209_v43  ;;  %v203_v46 = vsel %vm197_vm3, %v200_v37, %v202_v41 }
  0x57   : > { %v207_v47 = vsel %vm197_vm3, %v204_v39, %v206_v44  ;;  %v211_v48 = vsel %vm197_vm3, %v208_v40, %v210_v45  ;;  %v219_v53 = vmul.u32 %v212_v31, %v203_v46 }
  0x58   : > { %v674_v49 = vmul.u32.u64.low %v212_v31, %v211_v48  ;;  %v675_v50 = vmul.u32.u64.high %v212_v31, %v211_v48, %v674_v49  ;;  %v677_v51 = vmul.u32.u64.low %v212_v31, %v207_v47  ;;  %v678_v52 = vmul.u32.u64.high %v212_v31, %v207_v47, %v677_v51 }
  0x5a   : > { %vm221_vm5 = vc.u32 %v675_v50, %v677_v51  ;;  %v222_v54 = vadd.s32 1, %v678_v52  ;;  %v220_v1 = vadd.s32 %v677_v51, %v675_v50 }
  0x5c   : > { %v223_v55 = vsel %vm221_vm5, %v222_v54, %v678_v52 }
  0x5d   : > { %v224_v56 = vadd.s32 %v223_v55, %v219_v53 }
  0x5f   : > { %v225_v57 = vadd.s32 536870912, %v224_v56 }
  0x61   : > { %v226_v58 = vshrl.u32 %v225_v57, 30 }
  0x63   : > { %v227_v59 = vshll.u32 %v226_v58, 30  ;;  %v250_v15 = vsub.s32 4, %v226_v58 }
  0x65   : > { %v228_v60 = vsub.s32 %v224_v56, %v227_v59  ;;  %v251_v18 = vsel %vm166_vm7, %v250_v15, %v226_v58 }
  0x66   : > { %v253_v21 = vsel %vm165_vm8, 0, %v251_v18 }
  0x67   : > { %v230_v61 = vsub.s32 0, %v228_v60  ;;  %v257_v22 = vadd.s32 3, %v253_v21 }
  0x69   : > { %v362_v62 = vmin.u32 %v230_v61, %v228_v60  ;;  %v258_v23 = vand.u32 3, %v257_v22 }
  0x6b   : > { %v232_v63 = vclz %v362_v62  ;;  %vm263_vm9 = vcmp.eq.s32.totalorder %v258_v23, 2  ;;  %vm260_vm10 = vcmp.eq.s32.totalorder %v258_v23, 0  ;;  %vm259_vm11 = vcmp.lt.s32.totalorder %v258_v23, 2 }
  0x6d   : > { %v363_v0 = vadd.s32 4294967294, %v232_v63 }
  0x6f   : > { %vm364_vm6 = vcmp.lt.s32.totalorder %v363_v0, 0 }
  0x70   : > { %v235_v3 = vsel %vm364_vm6, 0, %v363_v0 }
  0x71   : > { %v236_v4 = vsub.s32 32, %v235_v3  ;;  %v237_v6 = vshll.u32 %v228_v60, %v235_v3  ;;  %v240_v7 = vsub.s32 4294967266, %v235_v3 }
  0x73   : > { %v238_v8 = vshrl.u32 %v220_v1, %v236_v4  ;;  %v241_v9 = vadd.s32 127, %v240_v7 }
  0x75   : > { %v239_v10 = vor.u32 %v238_v8, %v237_v6  ;;  %v242_v11 = vshll.u32 %v241_v9, 23 }
  0x77   : > { %v243_v12 = vor.u32 4788187, %v242_v11  ;;  %v246_v13 = vcvt.s32.f32 %v239_v10 }
  0x79   : > { %v244_v14 = vand.u32 2147483647, %v243_v12 }
  0x7b   : > { %v247_v16 = vmul.f32 %v246_v13, %v244_v14 }
  0x7d   : > { %v248_v17 = vxor.u32 2147483648, %v247_v16 }
  0x7f   : > { %v249_v19 = vsel %vm166_vm7, %v248_v17, %v247_v16 }
  0x80   : > { %v252_v20 = vsel %vm165_vm8, %v668_v2, %v249_v19 }
  0x81   : > { %425 = vcosq.f32 %v252_v20 }
  0x82   : > { %427 = vsinq.f32 %v252_v20 }
  0x8b   : > { %v426_v24 = vpop.eup %425 }
  0x8c   : > { %v428_v25 = vpop.eup %427  ;;  %v264_v26 = vxor.u32 2147483648, %v426_v24 }
  0x8d   : > { %v261_v5 = vxor.u32 2147483648, %v428_v25 }
  0x8e   : > { %v265_v27 = vsel %vm263_vm9, %v264_v26, %v428_v25 }
  0x8f   : > { %v262_v28 = vsel %vm260_vm10, %v426_v24, %v261_v5 }
  0x90   : > { %v266_v29 = vsel %vm259_vm11, %v262_v28, %v265_v27 }
  0x91   : > { %v267_v30 = vsel %vm256_vm12, nan, %v266_v29 }
  0x92   : > { %268 = vst [vmem:[%s159_s21] sm:$0xff] %v267_v30 }
  0x93   : > { %472 = shalt.err (!%p469_p4)
}
  0x94   : > { %s473_s15 = scalar_lea.hbm %s697_s6, 128  ;;  %s477_s20 = scalar_lea.hbm %s741_s2, 256 }
  0x95   : > { %p474_p5 = scmp.ne.s32.totalorder %s697_s6, %s473_s15  ;;  %p478_p0 = scmp.lt.u32.totalorder %s697_s6, %s741_s2 }
  0x96   : > { %p479_p1 = scmp.lt.u32.totalorder %s477_s20, %s473_s15  ;;  %p481_p6 = scmp.lt.u32.totalorder %s473_s15, %s697_s6 }
  0x97   : > { %p475_p8 = pnand %p474_p5, %p750_p11 }
  0x98   : > { %p480_p3 = por %p479_p1, %p478_p0 }
  0x99   : > { %p476_p9 = pneg %p475_p8 }
  0x9a   : > { %p482_p12 = por %p481_p6, %p480_p3 }
  0x9c   : > { %p483_p13 = pnand %p482_p12, %p476_p9 }
  0x9e   : > { %486 = shalt.err (!%p483_p13)
}
  0x9f   : > { %375 = dma.vmem_to_hbm [thread:$0]  (%p750_p11), %s692_s30, 128, %s697_s6, %s270_s7  }
  0xa0 PF: > { %s295_s26 = sand.u32 1, %s513_s11   ;;  %p751_p7 = scmp.ne.s32.totalorder %s746_s23, 0 }
  0xa1   : > { %p752_p10 = scmp.ge.s32.totalorder %s525_s14, 2  ;;  %s296_s27 = scalar_lea.sflag [#allocation5], %s295_s26 }
  0xa3   : > { %p382_p2 = pnand %p752_p10, %p751_p7 }
  0xa5   : > { %508 = dma.done.wait (!%p382_p2), %s296_s27, 128  }
  0xa6   : > { %510 = vsyncadd (!%p382_p2), %s296_s27, 4294967168  ;;  %p16_p4 = scmp.ge.s32.totalorder %s578_s16, 4   ;;  %s753_s11 = smov %s517_s12 }
  0xa7   : > { %s754_s12 = smov %s521_s13  ;;  %s755_s13 = smov %s590_s19 }
  0xa8   : > { %s756_s14 = smov %s578_s16  ;;  %18 = sbr.rel (!%p16_p4) target bundleno = 7 (0x7), region = 73 }
  0xaf   :  { %301 = vsyncpa [#allocation4], 1 }
  0xb0   :  { %303 = vsyncpa [#allocation4 + $0x1], 1 }
  0xb1   :  { %304 = vsyncpa [#allocation5], 1 }
  0xb2   :  { %306 = vsyncpa [#allocation5 + $0x1], 1 }

</bundles_post_ra>
